<compile_context>
chip_gen: v6e
topology: v6e:2x2x1
jax: 0.10.0
libtpu: 0.0.40
codegen_flags: <defaults>
</compile_context>

<pallas_src>
import jax
import jax.numpy as jnp
from jax import lax
from jax.experimental import pallas as pl
from jax.experimental.pallas import tpu as pltpu

# ---------------------------------------------------------------------------
# Problem sizes (small, consistent with the module)
# ---------------------------------------------------------------------------
B, C_IN, H, W = 2, 4, 16, 16
C_OUT, KH, KW = 8, 3, 3
PAD = 1                      # "same" padding for 3x3 stride-1 conv
K_DIM = KH * KW * C_IN       # 36  (folded contraction dim: k = (kh*KW+kw)*C_IN + c)
HW = H * W                   # 256 (per-batch lane extent, multiple of 128)
LANES = B * HW               # 512 (total lane/N extent of the single matmul)


# ---------------------------------------------------------------------------
# Pallas kernel: single invocation (no grid), one (C_OUT, K_DIM) @ (K_DIM, B*HW)
# MXU matmul, bias + ReLU, two vreg-aligned lane-dense stores (one per batch).
# ---------------------------------------------------------------------------
def conv_relu_kernel(p_ref, w_ref, b_ref, out_ref):
    # p_ref  : (K_DIM, B*HW)   im2col patches, lane = b*HW + h*W + w
    # w_ref  : (C_OUT, K_DIM)
    # b_ref  : (C_OUT, 1)
    # out_ref: (B, C_OUT, HW)  NCHW-flattened feature (lane-dense)
    acc = jnp.dot(w_ref[...], p_ref[...],
                  preferred_element_type=jnp.float32)      # (C_OUT, B*HW)
    bias = b_ref[...]                                       # (C_OUT, 1)
    # Static slices at lane 256 are vreg-aligned (2 * 128) -> unmasked stores.
    out_ref[0] = jnp.maximum(acc[:, :HW] + bias, 0.0)
    out_ref[1] = jnp.maximum(acc[:, HW:] + bias, 0.0)


def encoder_forward(x_nchw, w_oihw, bias):
    """Pallas implementation of Encoder.forward.

    x_nchw : (B, C_IN, H, W)       float32 (PyTorch layout)
    w_oihw : (C_OUT, C_IN, KH, KW) float32 (PyTorch Conv2d weight layout)
    bias   : (C_OUT,)              float32
    returns z : (B, C_OUT*H*W)     float32
    """
    # --- wrapper-side im2col; allow_input_fusion lets XLA fuse this into the
    #     pallas_call operands instead of materializing it separately -------
    x_pad = jnp.pad(x_nchw, ((0, 0), (0, 0), (PAD, PAD), (PAD, PAD)))
    taps = [x_pad[:, :, kh:kh + H, kw:kw + W]
            for kh in range(KH) for kw in range(KW)]        # 9 x (B, C_IN, H, W)
    patches = jnp.stack(taps, axis=0)                       # (9, B, C_IN, H, W)
    patches = jnp.transpose(patches, (0, 2, 1, 3, 4))       # (9, C_IN, B, H, W)
    patches = patches.reshape(K_DIM, LANES)                 # (36, 512), k = tap*C_IN + c
    w2 = jnp.transpose(w_oihw, (0, 2, 3, 1)).reshape(C_OUT, K_DIM)  # (8, 36), same k order
    b2 = bias.reshape(C_OUT, 1)

    feat = pl.pallas_call(
        conv_relu_kernel,
        out_shape=jax.ShapeDtypeStruct((B, C_OUT, HW), jnp.float32),
        # No grid: single invocation, whole (<100 KiB) problem resident in VMEM,
        # no auto-pipeline double buffers or prologue/epilogue DMA bookkeeping.
        in_specs=[
            pl.BlockSpec(memory_space=pltpu.MemorySpace.VMEM),  # patches
            pl.BlockSpec(memory_space=pltpu.MemorySpace.VMEM),  # weights
            pl.BlockSpec(memory_space=pltpu.MemorySpace.VMEM),  # bias
        ],
        out_specs=pl.BlockSpec(memory_space=pltpu.MemorySpace.VMEM),
        compiler_params=pltpu.CompilerParams(
            allow_input_fusion=[True, True, True]),
    )(patches, w2, b2)

    # feat is (B, C_OUT, H*W) == NCHW flattened -> matches torch's .view(B, -1)
    h = feat.reshape(B, -1)   # contiguous, free
    z = h                     # to_latent is None -> identity
    return z


# ---------------------------------------------------------------------------
# Pure-JAX reference (for correctness check)
# ---------------------------------------------------------------------------
def encoder_forward_ref(x_nchw, w_oihw, bias):
    feat = lax.conv_general_dilated(
        x_nchw, w_oihw,
        window_strides=(1, 1),
        padding=((PAD, PAD), (PAD, PAD)),
        dimension_numbers=("NCHW", "OIHW", "NCHW"),
    )
    feat = jnp.maximum(feat + bias.reshape(1, C_OUT, 1, 1), 0.0)
    return feat.reshape(B, -1)


if __name__ == "__main__":
    key = jax.random.PRNGKey(0)
    kx, kw, kb = jax.random.split(key, 3)

    # Deterministic synthetic parameters (shapes follow nn.Conv2d(4, 8, 3, padding=1))
    x = jax.random.normal(kx, (B, C_IN, H, W), dtype=jnp.float32)
    w = 0.1 * jax.random.normal(kw, (C_OUT, C_IN, KH, KW), dtype=jnp.float32)
    b = 0.1 * jax.random.normal(kb, (C_OUT,), dtype=jnp.float32)

    encoder = jax.jit(encoder_forward)  # single executable; im2col fusible into the call
    z = encoder(x, w, b)
    z = jax.block_until_ready(z)

    z_ref = encoder_forward_ref(x, w, b)
    assert z.shape == (B, C_OUT * H * W)
    assert jnp.allclose(z, z_ref, atol=1e-5, rtol=1e-5), "mismatch vs reference"

    print("KERNEL_OK")
</pallas_src>

<mosaic_0001>
module attributes {stable_mosaic.version = 11 : i64} {
  func.func @conv_relu_kernel(%arg0: memref<36x512xf32, #tpu.memory_space<vmem>>, %arg1: memref<8x36xf32, #tpu.memory_space<vmem>>, %arg2: memref<8x1xf32, #tpu.memory_space<vmem>>, %arg3: memref<2x8x256xf32, #tpu.memory_space<vmem>>) attributes {dimension_semantics = [], scalar_prefetch = 0 : i64, scratch_operands = 0 : i64, tpu.core_type = #tpu.core_type<tc>} {
    %c0 = arith.constant 0 : index
    %c0_0 = arith.constant 0 : index
    %0 = vector.load %arg1[%c0, %c0_0] : memref<8x36xf32, #tpu.memory_space<vmem>>, vector<8x36xf32>
    %c0_1 = arith.constant 0 : index
    %c0_2 = arith.constant 0 : index
    %1 = vector.load %arg0[%c0_1, %c0_2] : memref<36x512xf32, #tpu.memory_space<vmem>>, vector<36x512xf32>
    %cst = arith.constant dense<0.000000e+00> : vector<8x512xf32>
    %2 = tpu.matmul %0, %1, %cst {dimension_numbers = #tpu.dot_dimension_numbers<[1], [0], [0], [1], [0, 0, 1, 1], [], []>} : vector<8x36xf32>, vector<36x512xf32>, vector<8x512xf32> -> vector<8x512xf32>
    %c0_3 = arith.constant 0 : index
    %c0_4 = arith.constant 0 : index
    %3 = vector.load %arg2[%c0_3, %c0_4] : memref<8x1xf32, #tpu.memory_space<vmem>>, vector<8x1xf32>
    %4 = vector.extract_strided_slice %2 {offsets = [0, 0], sizes = [8, 256], strides = [1, 1]} : vector<8x512xf32> to vector<8x256xf32>
    %5 = vector.broadcast %3 : vector<8x1xf32> to vector<8x256xf32>
    %6 = arith.addf %4, %5 : vector<8x256xf32>
    %cst_5 = arith.constant 0.000000e+00 : f32
    %7 = vector.broadcast %cst_5 : f32 to vector<8x256xf32>
    %8 = arith.maximumf %6, %7 : vector<8x256xf32>
    %c0_6 = arith.constant 0 : index
    %c0_7 = arith.constant 0 : index
    %c0_8 = arith.constant 0 : index
    %9 = vector.load %arg3[%c0_6, %c0_7, %c0_8] : memref<2x8x256xf32, #tpu.memory_space<vmem>>, vector<1x8x256xf32>
    %10 = vector.shape_cast %9 : vector<1x8x256xf32> to vector<8x256xf32>
    %11 = vector.shape_cast %8 : vector<8x256xf32> to vector<1x8x256xf32>
    tpu.vector_store %arg3[%c0_6, %c0_7, %c0_8], %11 {strides = array<i32>} : memref<2x8x256xf32, #tpu.memory_space<vmem>>, vector<1x8x256xf32>,
    %12 = vector.extract_strided_slice %2 {offsets = [0, 256], sizes = [8, 256], strides = [1, 1]} : vector<8x512xf32> to vector<8x256xf32>
    %13 = vector.broadcast %3 : vector<8x1xf32> to vector<8x256xf32>
    %14 = arith.addf %12, %13 : vector<8x256xf32>
    %cst_9 = arith.constant 0.000000e+00 : f32
    %15 = vector.broadcast %cst_9 : f32 to vector<8x256xf32>
    %16 = arith.maximumf %14, %15 : vector<8x256xf32>
    %c1 = arith.constant 1 : index
    %c0_10 = arith.constant 0 : index
    %c0_11 = arith.constant 0 : index
    %17 = vector.load %arg3[%c1, %c0_10, %c0_11] : memref<2x8x256xf32, #tpu.memory_space<vmem>>, vector<1x8x256xf32>
    %18 = vector.shape_cast %17 : vector<1x8x256xf32> to vector<8x256xf32>
    %19 = vector.shape_cast %16 : vector<8x256xf32> to vector<1x8x256xf32>
    tpu.vector_store %arg3[%c1, %c0_10, %c0_11], %19 {strides = array<i32>} : memref<2x8x256xf32, #tpu.memory_space<vmem>>, vector<1x8x256xf32>,
    return
  }
}

</mosaic_0001>

<bundles_post_ra>
// kernel: encoder_forward.1
= control target key start
LH: loop header
LB: loop body
LE: loop exit
PB: predicated region body
PF: predicated region fallthrough
CT: control target
= control target key end

     0   :  { %vm39_vm0 = vcmask 1043456   ;;  %v228_v3 = vmov 0.0   ;;  %vm35_vm1 = vcmask 293888   ;;  %v229_v23 = vmov 0   ;;  %s328_s0 = inlined_call_operand.vmem [shape: f32[36,512], index: 0, kind: input, shape index: {}]   ;;  %s329_s1 = inlined_call_operand.vmem [shape: f32[8,36], index: 1, kind: input, shape index: {}]   ;;  %s330_s2 = inlined_call_operand.vmem [shape: f32[8,1], index: 2, kind: input, shape index: {}]   ;;  %s331_s3 = inlined_call_operand.vmem [shape: f32[2,8,256], index: 3, kind: output, shape index: {}]  }
   0x1   :  { %v32_v0 = vld [vmem:[%s328_s0 + $0x88] sm:$0xf]  ;;  %v34_v1 = vld [vmem:[%s328_s0 + $0x98] sm:$0xf]  ;;  %v31_v2 = vld [vmem:[%s328_s0 + $0x80] sm:$0xf]  ;;  %116 = vmatprep.mubr.f32.mxu0 %v228_v3  ;;  %187 = vmatprep.mubr.f32.mxu1 %v228_v3 }
   0x2   :  { %217 = vmatprep.subr.msk.mxu0 %vm39_vm0, %v32_v0  ;;  %220 = vmatprep.subr.msk.mxu1 %vm39_vm0, %v34_v1  ;;  %v33_v4 = vld [vmem:[%s328_s0 + $0x90] sm:$0xf]  ;;  %v28_v5 = vld [vmem:[%s328_s0 + $0x68] sm:$0xff]  ;;  %v30_v6 = vld [vmem:[%s328_s0 + $0x78] sm:$0xff] }
   0x3   :  { %218 = vmatpush1.msk.msra.mxu0 %vm39_vm0, %v31_v2  ;;  %221 = vmatpush1.msk.msra.mxu1 %vm39_vm0, %v33_v4  ;;  %v27_v7 = vld [vmem:[%s328_s0 + $0x60] sm:$0xff]  ;;  %v29_v8 = vld [vmem:[%s328_s0 + $0x70] sm:$0xff]  ;;  %v24_v9 = vld [vmem:[%s328_s0 + $0x48] sm:$0xff] }
   0x4   :  { %76 = vmatprep.subr.mxu0 %v28_v5  ;;  %147 = vmatprep.subr.mxu1 %v30_v6  ;;  %v26_v10 = vld [vmem:[%s328_s0 + $0x58] sm:$0xff]  ;;  %v23_v11 = vld [vmem:[%s328_s0 + $0x40] sm:$0xff]  ;;  %v25_v12 = vld [vmem:[%s328_s0 + $0x50] sm:$0xff] }
   0x5   :  { %77 = vmatpush1.msra.mxu0 %v27_v7  ;;  %148 = vmatpush1.msra.mxu1 %v29_v8  ;;  %v20_v13 = vld [vmem:[%s328_s0 + $0x28] sm:$0xff]  ;;  %v22_v14 = vld [vmem:[%s328_s0 + $0x38] sm:$0xff]  ;;  %v19_v15 = vld [vmem:[%s328_s0 + $0x20] sm:$0xff] }
   0x6   :  { %78 = vmatprep.subr.mxu0 %v24_v9  ;;  %149 = vmatprep.subr.mxu1 %v26_v10  ;;  %v21_v16 = vld [vmem:[%s328_s0 + $0x30] sm:$0xff]  ;;  %v16_v17 = vld [vmem:[%s328_s0 + $0x8] sm:$0xff]  ;;  %v18_v18 = vld [vmem:[%s328_s0 + $0x18] sm:$0xff] }
   0x7   :  { %79 = vmatpush1.msra.mxu0 %v23_v11  ;;  %150 = vmatpush1.msra.mxu1 %v25_v12  ;;  %v15_v19 = vld [vmem:[%s328_s0] sm:$0xff]  ;;  %v17_v20 = vld [vmem:[%s328_s0 + $0x10] sm:$0xff] }
   0x8   :  { %80 = vmatprep.subr.mxu0 %v20_v13  ;;  %151 = vmatprep.subr.mxu1 %v22_v14  ;;  %v14_v21 = vld [vmem:[%s329_s1] sm:$0xff] }
   0x9   :  { %81 = vmatpush1.msra.mxu0 %v19_v15  ;;  %152 = vmatpush1.msra.mxu1 %v21_v16  ;;  %v194_v22 = vld [vmem:[%s330_s2] sm:$0xff] }
   0xa   :  { %82 = vmatprep.subr.mxu0 %v16_v17  ;;  %153 = vmatprep.subr.mxu1 %v18_v18 }
   0xb   :  { %83 = vmatpush1.msra.mxu0 %v15_v19  ;;  %154 = vmatpush1.msra.mxu1 %v17_v20 }
   0xc   :  { %219 = vmatmul.mubr.msk.f32.vlgmr.msra.gmra.mxu0 %vm35_vm1, %v14_v21  ;;  %222 = vmatmul.mubr.msk.f32.vlgmr.msra.gmra.mxu1 %vm35_vm1, %v14_v21 }
   0xd   :  { %227 = vset.pattern.permute.xlu0 %v229_v23 }
   0xe   :  { %197 = vperm.xlu0 %227, %v194_v22  }
  0x89   :  { %v198_v24 = vpop.permute.xlu0 %197 }
  0xcc   :  { %v118_v25 = vpop.f32.mrf.mxu0  ;;  %v189_v26 = vpop.f32.mrf.mxu1 }
  0xcd   :  { %v200_v27 = vadd.f32 %v198_v24, %v118_v25  ;;  %v206_v28 = vadd.f32 %v198_v24, %v189_v26 }
  0xce   :  { %v120_v29 = vpop.f32.mrf.mxu0  ;;  %v191_v30 = vpop.f32.mrf.mxu1 }
  0xcf   :  { %v202_v31 = vmax.f32 %v200_v27, 0.0  ;;  %v208_v32 = vmax.f32 %v206_v28, 0.0  ;;  %v201_v33 = vadd.f32 %v198_v24, %v120_v29  ;;  %v207_v34 = vadd.f32 %v198_v24, %v191_v30 }
  0xd1   :  { %204 = vst [vmem:[%s331_s3] sm:$0xff] %v202_v31  ;;  %223 = vst [vmem:[%s331_s3 + $0x10] sm:$0xff] %v208_v32  ;;  %v203_v35 = vmax.f32 %v201_v33, 0.0  ;;  %v209_v36 = vmax.f32 %v207_v34, 0.0 }
  0xd3   :  { %205 = vst [vmem:[%s331_s3 + $0x8] sm:$0xff] %v203_v35  ;;  %224 = vst [vmem:[%s331_s3 + $0x18] sm:$0xff] %v209_v36 }

</bundles_post_ra>
